<compile_context>
chip_gen: v7x
topology: tpu7x:2x2x1
jax: 0.10.0
libtpu: 0.0.40
codegen_flags: <defaults>
</compile_context>

<pallas_src>
import functools

import jax
import jax.numpy as jnp
from jax.experimental import pallas as pl
from jax.experimental.pallas import tpu as pltpu

_VMEM_LIMIT = 32 * 1024 * 1024  # scoped VMEM request (>= v5e's 16 MiB default)


# ----------------------------------------------------------------------------
# Tile selection
# ----------------------------------------------------------------------------
def _pick_hw_tile(HW, bytes_per_lane, vmem_budget=16 * 1024 * 1024):
    """Largest multiple-of-128 divisor of HW whose double-buffered working set
    (all inputs that scale with the lane axis) stays under `vmem_budget`."""
    if HW % 128 != 0:
        return HW  # small / irregular spatial size: single full-width block
    max_lanes = max(128, (vmem_budget // (2 * bytes_per_lane)) // 128 * 128)
    t = min(HW, max_lanes)
    while HW % t != 0:
        t -= 128
    return t


# ----------------------------------------------------------------------------
# Pallas kernels
# ----------------------------------------------------------------------------
def _conv1x1_kernel(x_ref, wt_ref, o_ref, *, relu):
    # x: (1, Cin, thw)  wT: (Cout, Cin)  o: (1, Cout, thw)  -- lane axis = HW.
    y = jnp.dot(wt_ref[...], x_ref[0], preferred_element_type=jnp.float32)
    if relu:
        y = jnp.maximum(y, 0.0)  # fused ReLU: free VPU work, saves an HBM pass
    o_ref[0] = y.astype(o_ref.dtype)


def _pair_masked_sqerr_kernel(s_ref, t_ref, m_ref, o_ref):
    # s, t: (1, B, C, thw);  m: (B, 1, thw) pre-binarized mask;  o: (P,) SMEM.
    p = pl.program_id(0)
    j = pl.program_id(1)

    @pl.when(j == 0)
    def _():
        o_ref[p] = 0.0

    s = s_ref[0].astype(jnp.float32)
    t = t_ref[0].astype(jnp.float32)
    d = s - t
    o_ref[p] += jnp.sum(d * d * m_ref[...])  # mask broadcasts over channel axis


def _pair_sqerr_kernel(s_ref, t_ref, o_ref):
    # s, t: (1, B, C, thw);  o: (P,) SMEM.
    p = pl.program_id(0)
    j = pl.program_id(1)

    @pl.when(j == 0)
    def _():
        o_ref[p] = 0.0

    d = s_ref[0].astype(jnp.float32) - t_ref[0].astype(jnp.float32)
    o_ref[p] += jnp.sum(d * d)


# ----------------------------------------------------------------------------
# Pallas wrappers
# ----------------------------------------------------------------------------
def pallas_conv1x1(x_nchw, w_t, relu=False):
    """1x1 conv in native NCHW layout.

    x: (B, Cin, H, W), w_t: (Cout, Cin) -> (B, Cout, H, W).
    Computed as (Cout, Cin) @ (Cin, HW_tile); lane axis = H*W (lane dense)."""
    B, Cin, H, W = x_nchw.shape
    Cout = w_t.shape[0]
    HW = H * W
    x3 = x_nchw.reshape(B, Cin, HW)  # free reshape, no transpose
    thw = _pick_hw_tile(HW, bytes_per_lane=(Cin + Cout) * 4)
    out = pl.pallas_call(
        functools.partial(_conv1x1_kernel, relu=relu),
        out_shape=jax.ShapeDtypeStruct((B, Cout, HW), jnp.float32),
        grid=(B, HW // thw),
        in_specs=[
            pl.BlockSpec((1, Cin, thw), lambda b, j: (b, 0, j)),
            pl.BlockSpec((Cout, Cin), lambda b, j: (0, 0)),
        ],
        out_specs=pl.BlockSpec((1, Cout, thw), lambda b, j: (b, 0, j)),
        compiler_params=pltpu.CompilerParams(
            dimension_semantics=("parallel", "parallel"),
            vmem_limit_bytes=_VMEM_LIMIT,
        ),
    )(x3, w_t)
    return out.reshape(B, Cout, H, W)


def pallas_batched_masked_sqerr(s_stack, t_stack, m_bin):
    """s_stack, t_stack: (P, B, C, H, W); m_bin: (B, 1, H, W) binarized mask.

    Returns (P,) f32 vector of sum((s - t)^2 * m_bin) per pair, computed in one
    pallas_call with a pair grid axis and an HW-tiled reduction axis."""
    P, B, C, H, W = s_stack.shape
    HW = H * W
    s4 = s_stack.reshape(P, B, C, HW)
    t4 = t_stack.reshape(P, B, C, HW)
    m3 = m_bin.reshape(B, 1, HW).astype(jnp.float32)
    thw = _pick_hw_tile(HW, bytes_per_lane=(2 * B * C + B) * 4)
    return pl.pallas_call(
        _pair_masked_sqerr_kernel,
        out_shape=jax.ShapeDtypeStruct((P,), jnp.float32),
        grid=(P, HW // thw),
        in_specs=[
            pl.BlockSpec((1, B, C, thw), lambda p, j: (p, 0, 0, j)),
            pl.BlockSpec((1, B, C, thw), lambda p, j: (p, 0, 0, j)),
            pl.BlockSpec((B, 1, thw), lambda p, j: (0, 0, j)),
        ],
        out_specs=pl.BlockSpec(memory_space=pltpu.MemorySpace.SMEM),
        compiler_params=pltpu.CompilerParams(
            dimension_semantics=("arbitrary", "arbitrary"),
            vmem_limit_bytes=_VMEM_LIMIT,
        ),
    )(s4, t4, m3)


def pallas_batched_sqerr(s_stack, t_stack):
    """s_stack, t_stack: (P, B, C, H, W) -> (P,) f32 sums of squared diffs."""
    P, B, C, H, W = s_stack.shape
    HW = H * W
    s4 = s_stack.reshape(P, B, C, HW)
    t4 = t_stack.reshape(P, B, C, HW)
    thw = _pick_hw_tile(HW, bytes_per_lane=2 * B * C * 4)
    return pl.pallas_call(
        _pair_sqerr_kernel,
        out_shape=jax.ShapeDtypeStruct((P,), jnp.float32),
        grid=(P, HW // thw),
        in_specs=[
            pl.BlockSpec((1, B, C, thw), lambda p, j: (p, 0, 0, j)),
            pl.BlockSpec((1, B, C, thw), lambda p, j: (p, 0, 0, j)),
        ],
        out_specs=pl.BlockSpec(memory_space=pltpu.MemorySpace.SMEM),
        compiler_params=pltpu.CompilerParams(
            dimension_semantics=("arbitrary", "arbitrary"),
            vmem_limit_bytes=_VMEM_LIMIT,
        ),
    )(s4, t4)


# ----------------------------------------------------------------------------
# Glue (plain JAX): pooling, flips, mask preparation
# ----------------------------------------------------------------------------
def adaptive_avg_pool2d(x, out_hw):
    """F.adaptive_avg_pool2d for the divisible-size case used here."""
    B, C, Hin, Win = x.shape
    Ho, Wo = out_hw
    assert Hin % Ho == 0 and Win % Wo == 0
    kh, kw = Hin // Ho, Win // Wo
    return x.reshape(B, C, Ho, kh, Wo, kw).mean(axis=(3, 5))


def pooled_binary_mask(masks_stacked, out_hw):
    """Pool + threshold (>0.5) the GT mask once per level; return (mask, sum)."""
    m = adaptive_avg_pool2d(masks_stacked[:, None, :, :].astype(jnp.float32), out_hw)
    m_bin = (m > 0.5).astype(jnp.float32)
    return m_bin, jnp.sum(m_bin)


def _hflip(x):
    # TODO(synk): could be folded into the loss kernel via in-kernel lane
    # reversal instead of materializing a flipped copy; kept in JAX, computed
    # once per (student, level) rather than per (teacher, student, level).
    return jnp.flip(x, axis=-1)


def batch_hflip(feats):
    return [_hflip(f) for f in feats]


def avg_pool2(x):
    B, C, H, W = x.shape
    return x.reshape(B, C, H // 2, 2, W // 2, 2).mean(axis=(3, 5))


# ----------------------------------------------------------------------------
# Hint losses (semantics of the PyTorch reference functions)
# ----------------------------------------------------------------------------
def ffi_hint_loss(teachers, students, masks):
    masks = jnp.stack(masks)
    dists = []
    for s_f, t_f in zip(students, teachers):
        m_bin, msum = pooled_binary_mask(masks, s_f.shape[2:])
        ssq = pallas_batched_masked_sqerr(s_f[None], t_f[None], m_bin)[0]
        dists.append(ssq / (msum * s_f.shape[1]))
    return jnp.mean(jnp.stack(dists))


def fg_hint_loss(teachers, students, masks):
    new_teacher = [
        batch_hflip(feat) if i % 2 == 1 else list(feat)
        for i, feat in enumerate(teachers)
    ]
    hi_size = [f.shape for f in students[0]]
    masks = jnp.stack(masks)
    if len(students) > 1:
        ori_student_list = students[0::2]
        flip_student_list = students[1::2]
    else:
        ori_student_list = students
        flip_student_list = []
    # Mask pooled / binarized / summed ONCE per level (hoisted out of the pair loop).
    mask_info = [pooled_binary_mask(masks, size[2:]) for size in hi_size]

    dists = []
    for lvl in range(len(hi_size)):
        m_bin, msum = mask_info[lvl]
        s_list, t_list = [], []
        for feature in new_teacher:
            for student in ori_student_list:
                s_list.append(student[lvl])
                t_list.append(feature[lvl])
        if len(students) > 1:
            flipped_students = [_hflip(student[lvl]) for student in flip_student_list]
            for feature in new_teacher:
                for s_flipped in flipped_students:
                    s_list.append(s_flipped)
                    t_list.append(feature[lvl])
        s_stack = jnp.stack(s_list)  # (P, B, C, h, w) — one launch per level
        t_stack = jnp.stack(t_list)
        ssq = pallas_batched_masked_sqerr(s_stack, t_stack, m_bin)  # (P,)
        dists.append(ssq / (msum * s_stack.shape[2] + 1e-07))
    return jnp.mean(jnp.concatenate(dists))


def naive_hint_loss(teachers, students):
    dists = []
    for s_f, t_f in zip(students, teachers):
        ssq = pallas_batched_sqerr(s_f[None], t_f[None])[0]
        dists.append(ssq / s_f.size)
    return jnp.mean(jnp.stack(dists))


# ----------------------------------------------------------------------------
# Synthetic GeneralizedRCNN (distillation paths)
# ----------------------------------------------------------------------------
class GeneralizedRCNNPallas:
    """Synthetic stand-in for GeneralizedRCNN's teacher/student hint paths.

    backbone      -> 2-level FPN-ish feature extractor (avg-pool + 1x1 conv + ReLU).
    hint_adaptor  -> MaskRCNNFPNAdaptor: per-level 1x1 conv to embed dim.
    Weights stored pre-transposed as (Cout, Cin) for the lane-dense conv kernel.
    """
    # TODO(synk): build_rpn / box_roi_heads / mask_roi_heads / relation_nms
    # have no source in the reference module; the detection/NMS branches of
    # forward() are not reproduced here.

    def __init__(self, key, cin=3, cb=16, ce=32):
        k1, k2, k3, k4 = jax.random.split(key, 4)
        self.w_bb0 = 0.1 * jax.random.normal(k1, (cb, cin), jnp.float32)
        self.w_bb1 = 0.1 * jax.random.normal(k2, (cb, cb), jnp.float32)
        self.w_ad0 = 0.1 * jax.random.normal(k3, (ce, cb), jnp.float32)
        self.w_ad1 = 0.1 * jax.random.normal(k4, (ce, cb), jnp.float32)

    def backbone(self, imgs):
        x = avg_pool2(imgs)                                   # /2
        p0 = pallas_conv1x1(x, self.w_bb0, relu=True)         # (B, Cb, H/2, W/2)
        x1 = avg_pool2(p0)                                    # /4
        p1 = pallas_conv1x1(x1, self.w_bb1, relu=True)
        return [p0, p1]

    def hint_adaptor(self, feats):
        return [
            pallas_conv1x1(feats[0], self.w_ad0),
            pallas_conv1x1(feats[1], self.w_ad1),
        ]

    def extract_aug_feat(self, imglist, teacher=True):
        feat_list = []
        if teacher:
            for img in imglist:
                feat_list.append(self.backbone(img))
                feat_list.append(self.backbone(_hflip(img)))
        else:
            for i, img in enumerate(imglist):
                if i % 2 == 1:
                    img = _hflip(img)
                feat_list.append(self.backbone(img))
        return feat_list

    def get_emb_feature(self, feature_list):
        return [self.hint_adaptor(feat) for feat in feature_list]

    def get_fg_feature_loss(self, feature_list, seg_mask, teacher_feat):
        student_feat = self.get_emb_feature(feature_list)
        return fg_hint_loss(teacher_feat, student_feat, seg_mask)

    def get_ffi_loss(self, feature_list, int_mask, teacher_feature_flat):
        student_feat = self.get_emb_feature(feature_list)
        return ffi_hint_loss(teacher_feature_flat, student_feat[0], int_mask)

    def get_naive_hint_loss(self, feature_list, teacher_feature_flat):
        student_feat = self.get_emb_feature(feature_list)
        return naive_hint_loss(teacher_feature_flat, student_feat[0])


# ----------------------------------------------------------------------------
# Driver
# ----------------------------------------------------------------------------
if __name__ == "__main__":
    key = jax.random.PRNGKey(0)
    k_img, k_noise, k_teacher, k_student = jax.random.split(key, 4)

    B, Cin, H, W = 2, 3, 32, 32
    images_t = jax.random.normal(k_img, (B, Cin, H, W), jnp.float32)
    images_s = images_t + 0.05 * jax.random.normal(
        k_noise, (B, Cin, H, W), jnp.float32
    )

    # Per-image foreground segmentation masks (stand-in for decoded GT masks).
    mask = jnp.zeros((H, W), jnp.float32).at[8:24, 8:24].set(1.0)
    seg_masks = [mask for _ in range(B)]

    teacher = GeneralizedRCNNPallas(k_teacher)
    student = GeneralizedRCNNPallas(k_student)

    # --- forward_teacher (hint branch): ori + hflip aug features -> embeddings
    t_aug_feats = teacher.extract_aug_feat([images_t], teacher=True)
    t_embeddings = teacher.get_emb_feature(t_aug_feats)          # 2 sets x 2 lvls

    # --- forward_student: two augmented views (view 1 gets hflipped)
    s_feat_list = student.extract_aug_feat([images_s, images_s], teacher=False)

    loss_dict = {}
    loss_dict["mt_fg_loss"] = student.get_fg_feature_loss(
        s_feat_list, seg_masks, t_embeddings
    )
    loss_dict["mt_ffi_loss"] = student.get_ffi_loss(
        s_feat_list[:1], seg_masks, t_embeddings[0]
    )
    loss_dict["mt_odkd_loss"] = student.get_naive_hint_loss(
        s_feat_list[:1], t_embeddings[0]
    )

    loss_dict = {k: jax.block_until_ready(v) for k, v in loss_dict.items()}
    for k, v in loss_dict.items():
        assert jnp.isfinite(v), k
    print("KERNEL_OK")
</pallas_src>

<mosaic_0001>
module attributes {stable_mosaic.version = 11 : i64} {
  func.func @_conv1x1_kernel(%arg0: i32, %arg1: i32, %arg2: memref<1x3x256xf32, #tpu.memory_space<vmem>>, %arg3: memref<16x3xf32, #tpu.memory_space<vmem>>, %arg4: memref<1x16x256xf32, #tpu.memory_space<vmem>>) attributes {dimension_semantics = [#tpu.dimension_semantics<parallel>, #tpu.dimension_semantics<parallel>], iteration_bounds = array<i64: 2, 1>, scalar_prefetch = 0 : i64, scratch_operands = 0 : i64, tpu.core_type = #tpu.core_type<tc>, window_params = [{transform_indices = @transform_0, window_bounds = array<i64: 1, 3, 256>}, {pipeline_mode = #tpu.pipeline_mode<synchronous>, transform_indices = @transform_1, window_bounds = array<i64: 16, 3>}, {transform_indices = @transform_2, window_bounds = array<i64: 1, 16, 256>}]} {
    %c0 = arith.constant 0 : index
    %c0_0 = arith.constant 0 : index
    %0 = vector.load %arg3[%c0, %c0_0] : memref<16x3xf32, #tpu.memory_space<vmem>>, vector<16x3xf32>
    %c0_1 = arith.constant 0 : index
    %c0_2 = arith.constant 0 : index
    %c0_3 = arith.constant 0 : index
    %1 = vector.load %arg2[%c0_1, %c0_2, %c0_3] : memref<1x3x256xf32, #tpu.memory_space<vmem>>, vector<1x3x256xf32>
    %2 = vector.shape_cast %1 : vector<1x3x256xf32> to vector<3x256xf32>
    %cst = arith.constant dense<0.000000e+00> : vector<16x256xf32>
    %3 = tpu.matmul %0, %2, %cst {dimension_numbers = #tpu.dot_dimension_numbers<[1], [0], [0], [1], [0, 0, 1, 1], [], []>} : vector<16x3xf32>, vector<3x256xf32>, vector<16x256xf32> -> vector<16x256xf32>
    %cst_4 = arith.constant 0.000000e+00 : f32
    %4 = vector.broadcast %cst_4 : f32 to vector<16x256xf32>
    %5 = arith.maximumf %3, %4 : vector<16x256xf32>
    %c0_5 = arith.constant 0 : index
    %c0_6 = arith.constant 0 : index
    %c0_7 = arith.constant 0 : index
    %6 = vector.load %arg4[%c0_5, %c0_6, %c0_7] : memref<1x16x256xf32, #tpu.memory_space<vmem>>, vector<1x16x256xf32>
    %7 = vector.shape_cast %6 : vector<1x16x256xf32> to vector<16x256xf32>
    %8 = vector.shape_cast %5 : vector<16x256xf32> to vector<1x16x256xf32>
    tpu.vector_store %arg4[%c0_5, %c0_6, %c0_7], %8 {strides = array<i32>} : memref<1x16x256xf32, #tpu.memory_space<vmem>>, vector<1x16x256xf32>,
    return
  }
  func.func @transform_0(%arg0: i32, %arg1: i32) -> (i32, i32, i32) {
    %c0_i32 = arith.constant 0 : i32
    %c0_i32_0 = arith.constant 0 : i32
    return %arg0, %c0_i32, %arg1 : i32, i32, i32
  }
  func.func @transform_1(%arg0: i32, %arg1: i32) -> (i32, i32) {
    %c0_i32 = arith.constant 0 : i32
    %c0_i32_0 = arith.constant 0 : i32
    %c0_i32_1 = arith.constant 0 : i32
    return %c0_i32, %c0_i32_0 : i32, i32
  }
  func.func @transform_2(%arg0: i32, %arg1: i32) -> (i32, i32, i32) {
    %c0_i32 = arith.constant 0 : i32
    %c0_i32_0 = arith.constant 0 : i32
    return %arg0, %c0_i32, %arg1 : i32, i32, i32
  }
}

</mosaic_0001>

<bundles_post_ra>
// kernel: tpu_custom_call.1
= control target key start
LH: loop header
LB: loop body
LE: loop exit
PB: predicated region body
PF: predicated region fallthrough
CT: control target
= control target key end

     0   :  { %7 = vsyncpa [#allocation3], 0  ;;  %s670_s0 = inlined_call_operand.vmem [shape: f32[2,3,256], index: 0, kind: input, shape index: {}]   ;;  %s671_s1 = inlined_call_operand.vmem [shape: f32[16,3], index: 1, kind: input, shape index: {}]   ;;  %s672_s2 = inlined_call_operand.hbm [shape: f32[2,16,256], index: 2, kind: output, shape index: {}]  }
   0x1   :  { %9 = vsyncpa [#allocation3 + $0x1], 0  ;;  %s549_s9 = smov 0   ;;  %s551_s10 = smov 0  }
   0x2   :  { %s553_s11 = smov 0   ;;  %s555_s12 = smov 0  }
   0x3   :  { %s557_s13 = smov 0   ;;  %s559_s14 = smov 0  }
   0x4 LB: > { %s370_s15 = sadd.s32 4294967295, %s528_s14   ;;  %s371_s16 = sadd.s32 4294967294, %s528_s14   ;;  %s528_s14 = sphi %s559_s14, %s15_s14   ;;  %s524_s13 = sphi %s557_s13, %s679_s13   ;;  %s520_s12 = sphi %s555_s12, %s678_s12   ;;  %s516_s11 = sphi %s553_s11, %s677_s11   ;;  %s512_s10 = sphi %s551_s10, %s676_s10   ;;  %s508_s9 = sphi %s549_s9, %s675_s9  }
   0x5   : > { %s27_s17 = sadd.s32 1, %s524_s13  ;;  %s85_s18 = sadd.s32 1, %s516_s11 }
   0x6   : > { %p29_p0 = scmp.ge.s32.totalorder %s27_s17, 2  ;;  %p95_p1 = scmp.ne.s32.totalorder %s516_s11, %s512_s10 }
   0x7   : > { %p96_p2 = scmp.eq.s32.totalorder %s370_s15, 1  ;;  %p101_p3 = scmp.ne.s32.totalorder %s512_s10, %s508_s9 }
   0x8   : > { %s681_s17 = smov (%p29_p0, %s27_s17), 0  ;;  %p102_p5 = scmp.eq.s32.totalorder %s371_s16, 1 }
   0x9   : > { %p589_p4 = por %p96_p2, %p95_p1  ;;  %s80_s20 = ssub.s32 %s524_s13, %s681_s17 }
   0xa   : > { %p374_p6 = scmp.ge.s32.totalorder %s528_s14, 1  ;;  %p83_p7 = scmp.eq.s32.totalorder %s80_s20, 0 }
   0xb   : > { %p596_p8 = por %p102_p5, %p101_p3  ;;  %p136_p9 = scmp.lt.s32.totalorder %s528_s14, 3 }
   0xc   : > { %s602_s22 = scalar_select %p83_p7, %s516_s11, %s85_s18  }
   0xd   : > { %p137_p10 = pnand %p374_p6, %p136_p9 }
   0xe   : > { %p163_p11 = scmp.lt.s32.totalorder (!%p137_p10), %s520_s12, 1  ;;  %v530_v0 = vmov (!%p137_p10), 0.0   ;;  %vm185_vm0 = vcmask (!%p137_p10), 1042432   ;;  %v173_v3 = vld [vmem:[%s671_s1] sm:$0xff] (!%p137_p10)  ;;  %vm178_vm1 = vcmask (!%p137_p10), 23552   ;;  %v174_v4 = vld [vmem:[%s671_s1 + $0x8] sm:$0xff] (!%p137_p10) }
   0xf   : > { %140 = sbr.rel (%p137_p10) target bundleno = 261 (0x105), region = 28  ;;  %254 = vmatprep.mubr.f32.mxu0 (!%p137_p10), %v530_v0  ;;  %260 = vmatprep.mubr.f32.mxu1 (!%p137_p10), %v530_v0  ;;  %s159_s4 = sand.u32 (!%p137_p10), 1, %s512_s10  }
  0x10   : > { %s375_s5 = sshll.u32 (!%p137_p10), %s159_s4, 5  ;;  %s388_s8 = sshll.u32 (!%p137_p10), %s520_s12, 9 }
  0x11   : > { %s161_s6 = scalar_lea.vmem (!%p137_p10), [#allocation2], %s375_s5  ;;  %s622_s18 = scalar_lea.hbm (!%p137_p10), %s672_s2, %s388_s8 }
  0x12   : > { %s291_s7 = sshll.u32 (!%p137_p10), %s161_s6, 4  ;;  %s617_s7 = int_to_ptr.vmem [resolvable:$true] %s291_s7 }
  0x13   : > { %s450_s20 = scalar_lea.vmem (!%p137_p10), %s617_s7, 512 }
  0x14   : > { %p451_p12 = scmp.ne.s32.totalorder (!%p137_p10), %s617_s7, %s450_s20 }
  0x16   : > { %s164_s23 = scalar_select %p163_p11, %s520_s12, 1 }
  0x17   : > { %s624_s12 = scalar_lea.sflag [#allocation3], %s159_s4  ;;  %p452_p13 = pnand %p451_p12, %p589_p4 }
  0x18   : > { %s387_s24 = sshll.u32 %s164_s23, 3  ;;  %s531_s23 = smov [#allocation2]  }
  0x19   : > { %s170_s27 = scalar_lea.vmem %s670_s0, %s387_s24  ;;  %p453_p0 = pneg %p452_p13 }
  0x1a   : > { %v175_v1 = vld [vmem:[%s170_s27] sm:$0x77]  ;;  %s454_s24 = sshll.u32 %s531_s23, 4  ;;  %s455_s24 = int_to_ptr.vmem [resolvable:$false] %s454_s24 }
  0x1b   : > { %v177_v2 = vcombine.high %v175_v1, %v175_v1  ;;  %s456_s25 = scalar_lea.vmem %s455_s24, 1024  ;;  %p457_p1 = scmp.lt.s32.totalorder %s617_s7, %s455_s24 }
  0x1c   : > { %p458_p2 = scmp.lt.s32.totalorder %s456_s25, %s450_s20 }
  0x1d   : > { %378 = vmatprep.subr.msk.mxu0 %vm185_vm0, %v177_v2  ;;  %389 = vmatprep.subr.msk.mxu1 %vm185_vm0, %v177_v2 }
  0x1e   : > { %379 = vmatpush1.msk.msra.mxu0 %vm185_vm0, %v175_v1  ;;  %390 = vmatpush1.msk.msra.mxu1 %vm185_vm0, %v175_v1  ;;  %p459_p3 = por %p458_p2, %p457_p1 }
  0x1f   : > { %380 = vmatmul.mubr.msk.f32.vlgmr.msra.gmra.mrb[0].mxu0 %vm178_vm1, %v173_v3  ;;  %381 = vmatmul.mubr.msk.f32.vlgmr.msra.gmra.mrb[0].mxu1 %vm178_vm1, %v174_v4 }
  0x20   : > { %p460_p5 = pnand %p459_p3, %p453_p0 }
  0xf2   : > { %v256_v5 = vpop.f32.mrb[0].mxu0  ;;  %v262_v6 = vpop.f32.mrb[0].mxu1 }
  0xf3   : > { %v267_v7 = vmax.f32 %v256_v5, 0.0  ;;  %v269_v8 = vmax.f32 %v262_v6, 0.0  ;;  %v258_v9 = vpop.f32.mrb[1].mxu0  ;;  %v264_v10 = vpop.f32.mrb[1].mxu1 }
  0xf4   : > { %v268_v11 = vmax.f32 %v258_v9, 0.0  ;;  %v270_v12 = vmax.f32 %v264_v10, 0.0 }
  0xf5   : > { %271 = vst [vmem:[%s161_s6] sm:$0xff] %v267_v7  ;;  %273 = vst [vmem:[%s161_s6 + $0x10] sm:$0xff] %v269_v8 }
  0xf6   : > { %272 = vst [vmem:[%s161_s6 + $0x8] sm:$0xff] %v268_v11  ;;  %274 = vst [vmem:[%s161_s6 + $0x18] sm:$0xff] %v270_v12 }
  0xf7   : > { %463 = shalt.err (!%p460_p5)
}
  0xf8   : > { %s464_s26 = scalar_lea.hbm %s622_s18, 512  ;;  %s468_s29 = scalar_lea.hbm %s672_s2, 1024 }
  0xf9   : > { %p465_p6 = scmp.ne.s32.totalorder %s622_s18, %s464_s26  ;;  %p469_p10 = scmp.lt.u32.totalorder %s622_s18, %s672_s2 }
  0xfa   : > { %p470_p11 = scmp.lt.u32.totalorder %s468_s29, %s464_s26  ;;  %p472_p13 = scmp.lt.u32.totalorder %s464_s26, %s622_s18 }
  0xfb   : > { %p466_p7 = pnand %p465_p6, %p589_p4 }
  0xfc   : > { %p471_p12 = por %p470_p11, %p469_p10 }
  0xfd   : > { %p467_p9 = pneg %p466_p7 }
  0xfe   : > { %p473_p0 = por %p472_p13, %p471_p12 }
 0x100   : > { %p474_p1 = pnand %p473_p0, %p467_p9 }
 0x102   : > { %477 = shalt.err (!%p474_p1)
}
 0x103   : > { %s532_s4 = smov 256   ;;  %s533_s5 = smov 16  }
 0x104   : > { %391 = dma.vmem_to_hbm [thread:$0]  (%p589_p4), %s617_s7, 512, %s622_s18, %s624_s12, %s532_s4, %s532_s4, %s533_s5  }
 0x105 PF: > { %p397_p2 = scmp.ge.s32.totalorder %s528_s14, 2  ;;  %s306_s6 = sand.u32 1, %s508_s9  }
 0x106   : > { %s307_s8 = scalar_lea.sflag [#allocation3], %s306_s6 }
 0x107   : > { %p394_p3 = pnand %p397_p2, %p596_p8 }
 0x109   : > { %503 = dma.done.wait (!%p394_p3), %s307_s8, 512  }
 0x10a   : > { %505 = vsyncadd (!%p394_p3), %s307_s8, 4294966784  ;;  %s15_s14 = sadd.s32 1, %s528_s14   ;;  %s675_s9 = smov %s512_s10 }
 0x10b   : > { %p12_p5 = scmp.ge.s32.totalorder %s15_s14, 4   ;;  %s676_s10 = smov %s516_s11 }
 0x10c   : > { %s677_s11 = smov %s602_s22  ;;  %s678_s12 = smov %s524_s13 }
 0x10d   : > { %s679_s13 = smov %s681_s17  ;;  %14 = sbr.rel (!%p12_p5) target bundleno = 4 (0x4), region = 63 }
 0x114   :  { %312 = vsyncpa [#allocation3], 1 }
 0x115   :  { %314 = vsyncpa [#allocation3 + $0x1], 1 }

</bundles_post_ra>
